<compile_context>
chip_gen: v6e
topology: v6e:2x2x1
jax: 0.10.0
libtpu: 0.0.40
codegen_flags: <defaults>
</compile_context>

<pallas_src>
import functools

import jax
import jax.numpy as jnp
from jax.experimental import pallas as pl
from jax.experimental.pallas import tpu as pltpu


def discriminator_kernel(xemb_ref,          # (T*B_pad, E)  bf16, time-major slabs
                         wih_ref,           # (E, 8H)       bf16  fused fwd|bwd input weights
                         bih_ref,           # (1, 8H)       f32   fused (bih+bhh) fwd|bwd
                         whh_f_ref,         # (H, 4H)       bf16
                         w1_ref,            # (2H, H)       bf16  fused fc1 weight
                         b1_ref,            # (1, H)        f32
                         w2_ref,            # (1, H)        f32   fc2 row (VPU reduce)
                         b2_ref,            # (1, 1)        f32
                         out_ref,           # (B_pad, 1)    f32
                         *, T, B_pad):
    H4 = whh_f_ref.shape[1]      # 4H
    H = H4 // 4

    # ---- one batched bf16 input projection for ALL timesteps / BOTH directions ----
    pre = (jnp.dot(xemb_ref[...], wih_ref[...],
                   preferred_element_type=jnp.float32)
           + bih_ref[...])                                      # f32 (T*B_pad, 8H)

    whh_f = whh_f_ref[...]                                      # bf16 (H, 4H)

    # ---- forward-direction recurrence (only the h @ Whh chain is serial) ----
    # TODO(synk): for large T, switch to lax.fori_loop(unroll=2-4) with `pre`
    # staged in a VMEM scratch and the projection tiled over T (keeps vreg
    # pressure bounded and fits v7x's 64 MiB VMEM at production sizes).
    # TODO(synk): optionally hold whh_f resident in MXU weight registers across
    # the T steps via pltpu.matmul_push_rhs / matmul_acc_lhs / matmul_pop.
    h = jnp.zeros((B_pad, H), jnp.float32)
    c = jnp.zeros((B_pad, H), jnp.float32)
    for t in range(T):
        slab = pre[t * B_pad:(t + 1) * B_pad, :H4]              # aligned (B_pad, 4H) slice
        gates = slab + jnp.dot(h.astype(whh_f.dtype), whh_f,
                               preferred_element_type=jnp.float32)
        sg = jax.nn.sigmoid(gates)                              # full-vreg EUP (i, f, o)
        tg = jnp.tanh(gates)                                    # full-vreg EUP (g)
        i = sg[:, 0 * H:1 * H]
        f = sg[:, 1 * H:2 * H]
        g = tg[:, 2 * H:3 * H]
        o = sg[:, 3 * H:4 * H]
        c = f * c + i * g
        h = o * jnp.tanh(c)
    h_fwd = h

    # ---- backward direction: only its first step (on x_{T-1}) contributes.
    # Zero init => f*c == 0 and h @ Whh_b == 0, so c = i*g, h = o*tanh(i*g).
    gates_b = pre[(T - 1) * B_pad:T * B_pad, H4:]               # (B_pad, 4H), bias folded
    sgb = jax.nn.sigmoid(gates_b)
    tgb = jnp.tanh(gates_b)
    ib = sgb[:, 0 * H:1 * H]
    gb = tgb[:, 2 * H:3 * H]
    ob = sgb[:, 3 * H:4 * H]
    h_bwd = ob * jnp.tanh(ib * gb)

    # ---- fc1 as ONE fused (B, 2H) @ (2H, H) matmul on [h_fwd | h_bwd] ----
    h_cat = jnp.concatenate([h_fwd, h_bwd], axis=1).astype(w1_ref.dtype)
    z1 = (jnp.dot(h_cat, w1_ref[...], preferred_element_type=jnp.float32)
          + b1_ref[...])
    a1 = jnp.maximum(z1, 0.0)

    # TODO(synk): dropout(p=0.3) is identity here (eval-mode semantics; torch
    # train-mode RNG not reproduced).

    # ---- fc2 (out width 1): VPU multiply + lane reduce instead of an N=1 MXU matmul ----
    z2 = jnp.sum(a1 * w2_ref[...], axis=-1, keepdims=True) + b2_ref[...]
    out_ref[...] = jax.nn.sigmoid(z2)


def _full_spec(a):
    nd = a.ndim
    return pl.BlockSpec(a.shape, lambda i, _nd=nd: (0,) * _nd)


def prepare_params(params):
    """One-time weight repacking (hoisted out of the per-call path)."""
    H = params["b1"].shape[-1]
    # Fused fwd|bwd input weights -> single (E, 8H) matmul operand.
    wih_fused = jnp.concatenate([params["wih_f"].T, params["wih_b"].T], axis=1)
    b_fused = jnp.concatenate([params["bih_f"] + params["bhh_f"],
                               params["bih_b"] + params["bhh_b"]]).reshape(1, 8 * H)
    return {
        "hidden_dim": H,
        "emb_bf16": params["embedding"].astype(jnp.bfloat16),    # (V, E)
        "wih": wih_fused.astype(jnp.bfloat16),                   # (E, 8H)
        "bih": b_fused.astype(jnp.float32),                      # (1, 8H)
        "whh_f": params["whh_f"].T.astype(jnp.bfloat16),         # (H, 4H)
        "w1": params["w1"].T.astype(jnp.bfloat16),               # (2H, H) fused fc1
        "b1": params["b1"].reshape(1, H).astype(jnp.float32),
        "w2": params["w2"].reshape(1, H).astype(jnp.float32),
        "b2": params["b2"].reshape(1, 1).astype(jnp.float32),
    }


def discriminator_forward(tokens, packed):
    """tokens: (B, T) int32 token ids. Returns (B, 1) float32 probabilities."""
    B, T = tokens.shape
    H = packed["hidden_dim"]
    B_pad = max(8, ((B + 7) // 8) * 8)          # sublane-granular batch padding

    # Embedding gather + layout plumbing (wrapper-side XLA glue):
    # time-major, batch padded, flattened to (T*B_pad, E) bf16.
    # TODO(synk): fuse this gather into the kernel via scalar-prefetched token
    # ids + in-kernel row gather to drop the extra HBM round-trip.
    tok_tm = jnp.pad(jnp.transpose(tokens), ((0, 0), (0, B_pad - B)))   # (T, B_pad)
    xemb = jnp.take(packed["emb_bf16"], tok_tm, axis=0)                 # (T, B_pad, E)
    E = xemb.shape[-1]
    xemb2d = xemb.reshape(T * B_pad, E)                                 # (T*B_pad, E)

    args = (xemb2d, packed["wih"], packed["bih"], packed["whh_f"],
            packed["w1"], packed["b1"], packed["w2"], packed["b2"])

    kernel = functools.partial(discriminator_kernel, T=T, B_pad=B_pad)
    # TODO(synk): once B_pad exceeds one tile, add a batch-parallel leading grid
    # axis (dimension_semantics=("parallel", ...)) to use v7x's 2 TensorCores.
    out = pl.pallas_call(
        kernel,
        grid=(1,),
        in_specs=[_full_spec(a) for a in args],
        out_specs=pl.BlockSpec((B_pad, 1), lambda i: (0, 0)),
        out_shape=jax.ShapeDtypeStruct((B_pad, 1), jnp.float32),
        compiler_params=pltpu.CompilerParams(
            dimension_semantics=("arbitrary",)),
    )(*args)
    return out[:B]


def init_params(key, vocab_size, embedding_dim, hidden_dim):
    ks = jax.random.split(key, 12)
    s = 0.1
    E, H, V = embedding_dim, hidden_dim, vocab_size
    return {
        "embedding": s * jax.random.normal(ks[0], (V, E), jnp.float32),
        # LSTM forward direction (PyTorch shapes: (4H, E), (4H, H), (4H,), (4H,))
        # gate order i, f, g, o as in torch.nn.LSTM.
        "wih_f": s * jax.random.normal(ks[1], (4 * H, E), jnp.float32),
        "whh_f": s * jax.random.normal(ks[2], (4 * H, H), jnp.float32),
        "bih_f": s * jax.random.normal(ks[3], (4 * H,), jnp.float32),
        "bhh_f": s * jax.random.normal(ks[4], (4 * H,), jnp.float32),
        # LSTM backward direction (Whh_b never needed for lstm_out[:, -1, H:])
        "wih_b": s * jax.random.normal(ks[5], (4 * H, E), jnp.float32),
        "whh_b": s * jax.random.normal(ks[6], (4 * H, H), jnp.float32),
        "bih_b": s * jax.random.normal(ks[7], (4 * H,), jnp.float32),
        "bhh_b": s * jax.random.normal(ks[8], (4 * H,), jnp.float32),
        # fc1: Linear(2H -> H), fc2: Linear(H -> 1)  (PyTorch (out, in) layout)
        "w1": s * jax.random.normal(ks[9], (H, 2 * H), jnp.float32),
        "b1": s * jax.random.normal(ks[10], (H,), jnp.float32),
        "w2": s * jax.random.normal(ks[11], (1, H), jnp.float32),
        "b2": jnp.zeros((1,), jnp.float32),
    }


if __name__ == "__main__":
    VOCAB, EMB, HID = 50, 32, 32
    B, T = 2, 8

    key = jax.random.PRNGKey(0)
    pkey, tkey = jax.random.split(key)
    params = init_params(pkey, VOCAB, EMB, HID)
    packed = prepare_params(params)               # one-time weight repacking
    tokens = jax.random.randint(tkey, (B, T), 0, VOCAB, dtype=jnp.int32)

    out = discriminator_forward(tokens, packed)
    out = jax.block_until_ready(out)
    assert out.shape == (B, 1)
    assert bool(jnp.all((out >= 0.0) & (out <= 1.0)))
    print("KERNEL_OK")
</pallas_src>

<mosaic_0001>
module attributes {stable_mosaic.version = 11 : i64} {
  func.func @discriminator_kernel(%arg0: i32, %arg1: memref<64x32xbf16, #tpu.memory_space<vmem>>, %arg2: memref<32x256xbf16, #tpu.memory_space<vmem>>, %arg3: memref<1x256xf32, #tpu.memory_space<vmem>>, %arg4: memref<32x128xbf16, #tpu.memory_space<vmem>>, %arg5: memref<64x32xbf16, #tpu.memory_space<vmem>>, %arg6: memref<1x32xf32, #tpu.memory_space<vmem>>, %arg7: memref<1x32xf32, #tpu.memory_space<vmem>>, %arg8: memref<1x1xf32, #tpu.memory_space<vmem>>, %arg9: memref<8x1xf32, #tpu.memory_space<vmem>>) attributes {dimension_semantics = [#tpu.dimension_semantics<arbitrary>], iteration_bounds = array<i64: 1>, scalar_prefetch = 0 : i64, scratch_operands = 0 : i64, tpu.core_type = #tpu.core_type<tc>, window_params = [{pipeline_mode = #tpu.pipeline_mode<synchronous>, transform_indices = @transform_0, window_bounds = array<i64: 64, 32>}, {pipeline_mode = #tpu.pipeline_mode<synchronous>, transform_indices = @transform_1, window_bounds = array<i64: 32, 256>}, {pipeline_mode = #tpu.pipeline_mode<synchronous>, transform_indices = @transform_2, window_bounds = array<i64: 1, 256>}, {pipeline_mode = #tpu.pipeline_mode<synchronous>, transform_indices = @transform_3, window_bounds = array<i64: 32, 128>}, {pipeline_mode = #tpu.pipeline_mode<synchronous>, transform_indices = @transform_4, window_bounds = array<i64: 64, 32>}, {pipeline_mode = #tpu.pipeline_mode<synchronous>, transform_indices = @transform_5, window_bounds = array<i64: 1, 32>}, {pipeline_mode = #tpu.pipeline_mode<synchronous>, transform_indices = @transform_6, window_bounds = array<i64: 1, 32>}, {pipeline_mode = #tpu.pipeline_mode<synchronous>, transform_indices = @transform_7, window_bounds = array<i64: 1, 1>}, {pipeline_mode = #tpu.pipeline_mode<synchronous>, transform_indices = @transform_8, window_bounds = array<i64: 8, 1>}]} {
    %c0 = arith.constant 0 : index
    %c0_0 = arith.constant 0 : index
    %0 = vector.load %arg1[%c0, %c0_0] : memref<64x32xbf16, #tpu.memory_space<vmem>>, vector<64x32xbf16>
    %c0_1 = arith.constant 0 : index
    %c0_2 = arith.constant 0 : index
    %1 = vector.load %arg2[%c0_1, %c0_2] : memref<32x256xbf16, #tpu.memory_space<vmem>>, vector<32x256xbf16>
    %cst = arith.constant dense<0.000000e+00> : vector<64x256xf32>
    %2 = tpu.matmul %0, %1, %cst {dimension_numbers = #tpu.dot_dimension_numbers<[1], [0], [0], [1], [0, 0, 1, 1], [], []>} : vector<64x32xbf16>, vector<32x256xbf16>, vector<64x256xf32> -> vector<64x256xf32>
    %c0_3 = arith.constant 0 : index
    %c0_4 = arith.constant 0 : index
    %3 = vector.load %arg3[%c0_3, %c0_4] : memref<1x256xf32, #tpu.memory_space<vmem>>, vector<1x256xf32>
    %4 = vector.broadcast %3 : vector<1x256xf32> to vector<64x256xf32>
    %5 = arith.addf %2, %4 : vector<64x256xf32>
    %c0_5 = arith.constant 0 : index
    %c0_6 = arith.constant 0 : index
    %6 = vector.load %arg4[%c0_5, %c0_6] : memref<32x128xbf16, #tpu.memory_space<vmem>>, vector<32x128xbf16>
    %cst_7 = arith.constant 0.000000e+00 : f32
    %7 = vector.broadcast %cst_7 : f32 to vector<8x32xf32>
    %cst_8 = arith.constant 0.000000e+00 : f32
    %8 = vector.broadcast %cst_8 : f32 to vector<8x32xf32>
    %9 = vector.extract_strided_slice %5 {offsets = [0, 0], sizes = [8, 128], strides = [1, 1]} : vector<64x256xf32> to vector<8x128xf32>
    %10 = arith.truncf %7 : vector<8x32xf32> to vector<8x32xbf16>
    %cst_9 = arith.constant dense<0.000000e+00> : vector<8x128xf32>
    %11 = tpu.matmul %10, %6, %cst_9 {dimension_numbers = #tpu.dot_dimension_numbers<[1], [0], [0], [1], [0, 0, 1, 1], [], []>} : vector<8x32xbf16>, vector<32x128xbf16>, vector<8x128xf32> -> vector<8x128xf32>
    %12 = arith.addf %9, %11 : vector<8x128xf32>
    %13 = arith.negf %12 : vector<8x128xf32>
    %14 = math.exp %13 : vector<8x128xf32>
    %cst_10 = arith.constant 1.000000e+00 : f32
    %15 = vector.broadcast %cst_10 : f32 to vector<8x128xf32>
    %16 = arith.addf %15, %14 : vector<8x128xf32>
    %17 = arith.divf %15, %16 : vector<8x128xf32>
    %18 = math.tanh %12 : vector<8x128xf32>
    %19 = vector.extract_strided_slice %17 {offsets = [0, 0], sizes = [8, 32], strides = [1, 1]} : vector<8x128xf32> to vector<8x32xf32>
    %20 = vector.extract_strided_slice %17 {offsets = [0, 32], sizes = [8, 32], strides = [1, 1]} : vector<8x128xf32> to vector<8x32xf32>
    %21 = vector.extract_strided_slice %18 {offsets = [0, 64], sizes = [8, 32], strides = [1, 1]} : vector<8x128xf32> to vector<8x32xf32>
    %22 = vector.extract_strided_slice %17 {offsets = [0, 96], sizes = [8, 32], strides = [1, 1]} : vector<8x128xf32> to vector<8x32xf32>
    %23 = arith.mulf %20, %8 : vector<8x32xf32>
    %24 = arith.mulf %19, %21 : vector<8x32xf32>
    %25 = arith.addf %23, %24 : vector<8x32xf32>
    %26 = math.tanh %25 : vector<8x32xf32>
    %27 = arith.mulf %22, %26 : vector<8x32xf32>
    %28 = vector.extract_strided_slice %5 {offsets = [8, 0], sizes = [8, 128], strides = [1, 1]} : vector<64x256xf32> to vector<8x128xf32>
    %29 = arith.truncf %27 : vector<8x32xf32> to vector<8x32xbf16>
    %cst_11 = arith.constant dense<0.000000e+00> : vector<8x128xf32>
    %30 = tpu.matmul %29, %6, %cst_11 {dimension_numbers = #tpu.dot_dimension_numbers<[1], [0], [0], [1], [0, 0, 1, 1], [], []>} : vector<8x32xbf16>, vector<32x128xbf16>, vector<8x128xf32> -> vector<8x128xf32>
    %31 = arith.addf %28, %30 : vector<8x128xf32>
    %32 = arith.negf %31 : vector<8x128xf32>
    %33 = math.exp %32 : vector<8x128xf32>
    %cst_12 = arith.constant 1.000000e+00 : f32
    %34 = vector.broadcast %cst_12 : f32 to vector<8x128xf32>
    %35 = arith.addf %34, %33 : vector<8x128xf32>
    %36 = arith.divf %34, %35 : vector<8x128xf32>
    %37 = math.tanh %31 : vector<8x128xf32>
    %38 = vector.extract_strided_slice %36 {offsets = [0, 0], sizes = [8, 32], strides = [1, 1]} : vector<8x128xf32> to vector<8x32xf32>
    %39 = vector.extract_strided_slice %36 {offsets = [0, 32], sizes = [8, 32], strides = [1, 1]} : vector<8x128xf32> to vector<8x32xf32>
    %40 = vector.extract_strided_slice %37 {offsets = [0, 64], sizes = [8, 32], strides = [1, 1]} : vector<8x128xf32> to vector<8x32xf32>
    %41 = vector.extract_strided_slice %36 {offsets = [0, 96], sizes = [8, 32], strides = [1, 1]} : vector<8x128xf32> to vector<8x32xf32>
    %42 = arith.mulf %39, %25 : vector<8x32xf32>
    %43 = arith.mulf %38, %40 : vector<8x32xf32>
    %44 = arith.addf %42, %43 : vector<8x32xf32>
    %45 = math.tanh %44 : vector<8x32xf32>
    %46 = arith.mulf %41, %45 : vector<8x32xf32>
    %47 = vector.extract_strided_slice %5 {offsets = [16, 0], sizes = [8, 128], strides = [1, 1]} : vector<64x256xf32> to vector<8x128xf32>
    %48 = arith.truncf %46 : vector<8x32xf32> to vector<8x32xbf16>
    %cst_13 = arith.constant dense<0.000000e+00> : vector<8x128xf32>
    %49 = tpu.matmul %48, %6, %cst_13 {dimension_numbers = #tpu.dot_dimension_numbers<[1], [0], [0], [1], [0, 0, 1, 1], [], []>} : vector<8x32xbf16>, vector<32x128xbf16>, vector<8x128xf32> -> vector<8x128xf32>
    %50 = arith.addf %47, %49 : vector<8x128xf32>
    %51 = arith.negf %50 : vector<8x128xf32>
    %52 = math.exp %51 : vector<8x128xf32>
    %cst_14 = arith.constant 1.000000e+00 : f32
    %53 = vector.broadcast %cst_14 : f32 to vector<8x128xf32>
    %54 = arith.addf %53, %52 : vector<8x128xf32>
    %55 = arith.divf %53, %54 : vector<8x128xf32>
    %56 = math.tanh %50 : vector<8x128xf32>
    %57 = vector.extract_strided_slice %55 {offsets = [0, 0], sizes = [8, 32], strides = [1, 1]} : vector<8x128xf32> to vector<8x32xf32>
    %58 = vector.extract_strided_slice %55 {offsets = [0, 32], sizes = [8, 32], strides = [1, 1]} : vector<8x128xf32> to vector<8x32xf32>
    %59 = vector.extract_strided_slice %56 {offsets = [0, 64], sizes = [8, 32], strides = [1, 1]} : vector<8x128xf32> to vector<8x32xf32>
    %60 = vector.extract_strided_slice %55 {offsets = [0, 96], sizes = [8, 32], strides = [1, 1]} : vector<8x128xf32> to vector<8x32xf32>
    %61 = arith.mulf %58, %44 : vector<8x32xf32>
    %62 = arith.mulf %57, %59 : vector<8x32xf32>
    %63 = arith.addf %61, %62 : vector<8x32xf32>
    %64 = math.tanh %63 : vector<8x32xf32>
    %65 = arith.mulf %60, %64 : vector<8x32xf32>
    %66 = vector.extract_strided_slice %5 {offsets = [24, 0], sizes = [8, 128], strides = [1, 1]} : vector<64x256xf32> to vector<8x128xf32>
    %67 = arith.truncf %65 : vector<8x32xf32> to vector<8x32xbf16>
    %cst_15 = arith.constant dense<0.000000e+00> : vector<8x128xf32>
    %68 = tpu.matmul %67, %6, %cst_15 {dimension_numbers = #tpu.dot_dimension_numbers<[1], [0], [0], [1], [0, 0, 1, 1], [], []>} : vector<8x32xbf16>, vector<32x128xbf16>, vector<8x128xf32> -> vector<8x128xf32>
    %69 = arith.addf %66, %68 : vector<8x128xf32>
    %70 = arith.negf %69 : vector<8x128xf32>
    %71 = math.exp %70 : vector<8x128xf32>
    %cst_16 = arith.constant 1.000000e+00 : f32
    %72 = vector.broadcast %cst_16 : f32 to vector<8x128xf32>
    %73 = arith.addf %72, %71 : vector<8x128xf32>
    %74 = arith.divf %72, %73 : vector<8x128xf32>
    %75 = math.tanh %69 : vector<8x128xf32>
    %76 = vector.extract_strided_slice %74 {offsets = [0, 0], sizes = [8, 32], strides = [1, 1]} : vector<8x128xf32> to vector<8x32xf32>
    %77 = vector.extract_strided_slice %74 {offsets = [0, 32], sizes = [8, 32], strides = [1, 1]} : vector<8x128xf32> to vector<8x32xf32>
    %78 = vector.extract_strided_slice %75 {offsets = [0, 64], sizes = [8, 32], strides = [1, 1]} : vector<8x128xf32> to vector<8x32xf32>
    %79 = vector.extract_strided_slice %74 {offsets = [0, 96], sizes = [8, 32], strides = [1, 1]} : vector<8x128xf32> to vector<8x32xf32>
    %80 = arith.mulf %77, %63 : vector<8x32xf32>
    %81 = arith.mulf %76, %78 : vector<8x32xf32>
    %82 = arith.addf %80, %81 : vector<8x32xf32>
    %83 = math.tanh %82 : vector<8x32xf32>
    %84 = arith.mulf %79, %83 : vector<8x32xf32>
    %85 = vector.extract_strided_slice %5 {offsets = [32, 0], sizes = [8, 128], strides = [1, 1]} : vector<64x256xf32> to vector<8x128xf32>
    %86 = arith.truncf %84 : vector<8x32xf32> to vector<8x32xbf16>
    %cst_17 = arith.constant dense<0.000000e+00> : vector<8x128xf32>
    %87 = tpu.matmul %86, %6, %cst_17 {dimension_numbers = #tpu.dot_dimension_numbers<[1], [0], [0], [1], [0, 0, 1, 1], [], []>} : vector<8x32xbf16>, vector<32x128xbf16>, vector<8x128xf32> -> vector<8x128xf32>
    %88 = arith.addf %85, %87 : vector<8x128xf32>
    %89 = arith.negf %88 : vector<8x128xf32>
    %90 = math.exp %89 : vector<8x128xf32>
    %cst_18 = arith.constant 1.000000e+00 : f32
    %91 = vector.broadcast %cst_18 : f32 to vector<8x128xf32>
    %92 = arith.addf %91, %90 : vector<8x128xf32>
    %93 = arith.divf %91, %92 : vector<8x128xf32>
    %94 = math.tanh %88 : vector<8x128xf32>
    %95 = vector.extract_strided_slice %93 {offsets = [0, 0], sizes = [8, 32], strides = [1, 1]} : vector<8x128xf32> to vector<8x32xf32>
    %96 = vector.extract_strided_slice %93 {offsets = [0, 32], sizes = [8, 32], strides = [1, 1]} : vector<8x128xf32> to vector<8x32xf32>
    %97 = vector.extract_strided_slice %94 {offsets = [0, 64], sizes = [8, 32], strides = [1, 1]} : vector<8x128xf32> to vector<8x32xf32>
    %98 = vector.extract_strided_slice %93 {offsets = [0, 96], sizes = [8, 32], strides = [1, 1]} : vector<8x128xf32> to vector<8x32xf32>
    %99 = arith.mulf %96, %82 : vector<8x32xf32>
    %100 = arith.mulf %95, %97 : vector<8x32xf32>
    %101 = arith.addf %99, %100 : vector<8x32xf32>
    %102 = math.tanh %101 : vector<8x32xf32>
    %103 = arith.mulf %98, %102 : vector<8x32xf32>
    %104 = vector.extract_strided_slice %5 {offsets = [40, 0], sizes = [8, 128], strides = [1, 1]} : vector<64x256xf32> to vector<8x128xf32>
    %105 = arith.truncf %103 : vector<8x32xf32> to vector<8x32xbf16>
    %cst_19 = arith.constant dense<0.000000e+00> : vector<8x128xf32>
    %106 = tpu.matmul %105, %6, %cst_19 {dimension_numbers = #tpu.dot_dimension_numbers<[1], [0], [0], [1], [0, 0, 1, 1], [], []>} : vector<8x32xbf16>, vector<32x128xbf16>, vector<8x128xf32> -> vector<8x128xf32>
    %107 = arith.addf %104, %106 : vector<8x128xf32>
    %108 = arith.negf %107 : vector<8x128xf32>
    %109 = math.exp %108 : vector<8x128xf32>
    %cst_20 = arith.constant 1.000000e+00 : f32
    %110 = vector.broadcast %cst_20 : f32 to vector<8x128xf32>
    %111 = arith.addf %110, %109 : vector<8x128xf32>
    %112 = arith.divf %110, %111 : vector<8x128xf32>
    %113 = math.tanh %107 : vector<8x128xf32>
    %114 = vector.extract_strided_slice %112 {offsets = [0, 0], sizes = [8, 32], strides = [1, 1]} : vector<8x128xf32> to vector<8x32xf32>
    %115 = vector.extract_strided_slice %112 {offsets = [0, 32], sizes = [8, 32], strides = [1, 1]} : vector<8x128xf32> to vector<8x32xf32>
    %116 = vector.extract_strided_slice %113 {offsets = [0, 64], sizes = [8, 32], strides = [1, 1]} : vector<8x128xf32> to vector<8x32xf32>
    %117 = vector.extract_strided_slice %112 {offsets = [0, 96], sizes = [8, 32], strides = [1, 1]} : vector<8x128xf32> to vector<8x32xf32>
    %118 = arith.mulf %115, %101 : vector<8x32xf32>
    %119 = arith.mulf %114, %116 : vector<8x32xf32>
    %120 = arith.addf %118, %119 : vector<8x32xf32>
    %121 = math.tanh %120 : vector<8x32xf32>
    %122 = arith.mulf %117, %121 : vector<8x32xf32>
    %123 = vector.extract_strided_slice %5 {offsets = [48, 0], sizes = [8, 128], strides = [1, 1]} : vector<64x256xf32> to vector<8x128xf32>
    %124 = arith.truncf %122 : vector<8x32xf32> to vector<8x32xbf16>
    %cst_21 = arith.constant dense<0.000000e+00> : vector<8x128xf32>
    %125 = tpu.matmul %124, %6, %cst_21 {dimension_numbers = #tpu.dot_dimension_numbers<[1], [0], [0], [1], [0, 0, 1, 1], [], []>} : vector<8x32xbf16>, vector<32x128xbf16>, vector<8x128xf32> -> vector<8x128xf32>
    %126 = arith.addf %123, %125 : vector<8x128xf32>
    %127 = arith.negf %126 : vector<8x128xf32>
    %128 = math.exp %127 : vector<8x128xf32>
    %cst_22 = arith.constant 1.000000e+00 : f32
    %129 = vector.broadcast %cst_22 : f32 to vector<8x128xf32>
    %130 = arith.addf %129, %128 : vector<8x128xf32>
    %131 = arith.divf %129, %130 : vector<8x128xf32>
    %132 = math.tanh %126 : vector<8x128xf32>
    %133 = vector.extract_strided_slice %131 {offsets = [0, 0], sizes = [8, 32], strides = [1, 1]} : vector<8x128xf32> to vector<8x32xf32>
    %134 = vector.extract_strided_slice %131 {offsets = [0, 32], sizes = [8, 32], strides = [1, 1]} : vector<8x128xf32> to vector<8x32xf32>
    %135 = vector.extract_strided_slice %132 {offsets = [0, 64], sizes = [8, 32], strides = [1, 1]} : vector<8x128xf32> to vector<8x32xf32>
    %136 = vector.extract_strided_slice %131 {offsets = [0, 96], sizes = [8, 32], strides = [1, 1]} : vector<8x128xf32> to vector<8x32xf32>
    %137 = arith.mulf %134, %120 : vector<8x32xf32>
    %138 = arith.mulf %133, %135 : vector<8x32xf32>
    %139 = arith.addf %137, %138 : vector<8x32xf32>
    %140 = math.tanh %139 : vector<8x32xf32>
    %141 = arith.mulf %136, %140 : vector<8x32xf32>
    %142 = vector.extract_strided_slice %5 {offsets = [56, 0], sizes = [8, 128], strides = [1, 1]} : vector<64x256xf32> to vector<8x128xf32>
    %143 = arith.truncf %141 : vector<8x32xf32> to vector<8x32xbf16>
    %cst_23 = arith.constant dense<0.000000e+00> : vector<8x128xf32>
    %144 = tpu.matmul %143, %6, %cst_23 {dimension_numbers = #tpu.dot_dimension_numbers<[1], [0], [0], [1], [0, 0, 1, 1], [], []>} : vector<8x32xbf16>, vector<32x128xbf16>, vector<8x128xf32> -> vector<8x128xf32>
    %145 = arith.addf %142, %144 : vector<8x128xf32>
    %146 = arith.negf %145 : vector<8x128xf32>
    %147 = math.exp %146 : vector<8x128xf32>
    %cst_24 = arith.constant 1.000000e+00 : f32
    %148 = vector.broadcast %cst_24 : f32 to vector<8x128xf32>
    %149 = arith.addf %148, %147 : vector<8x128xf32>
    %150 = arith.divf %148, %149 : vector<8x128xf32>
    %151 = math.tanh %145 : vector<8x128xf32>
    %152 = vector.extract_strided_slice %150 {offsets = [0, 0], sizes = [8, 32], strides = [1, 1]} : vector<8x128xf32> to vector<8x32xf32>
    %153 = vector.extract_strided_slice %150 {offsets = [0, 32], sizes = [8, 32], strides = [1, 1]} : vector<8x128xf32> to vector<8x32xf32>
    %154 = vector.extract_strided_slice %151 {offsets = [0, 64], sizes = [8, 32], strides = [1, 1]} : vector<8x128xf32> to vector<8x32xf32>
    %155 = vector.extract_strided_slice %150 {offsets = [0, 96], sizes = [8, 32], strides = [1, 1]} : vector<8x128xf32> to vector<8x32xf32>
    %156 = arith.mulf %153, %139 : vector<8x32xf32>
    %157 = arith.mulf %152, %154 : vector<8x32xf32>
    %158 = arith.addf %156, %157 : vector<8x32xf32>
    %159 = math.tanh %158 : vector<8x32xf32>
    %160 = arith.mulf %155, %159 : vector<8x32xf32>
    %161 = vector.extract_strided_slice %5 {offsets = [56, 128], sizes = [8, 128], strides = [1, 1]} : vector<64x256xf32> to vector<8x128xf32>
    %162 = arith.negf %161 : vector<8x128xf32>
    %163 = math.exp %162 : vector<8x128xf32>
    %cst_25 = arith.constant 1.000000e+00 : f32
    %164 = vector.broadcast %cst_25 : f32 to vector<8x128xf32>
    %165 = arith.addf %164, %163 : vector<8x128xf32>
    %166 = arith.divf %164, %165 : vector<8x128xf32>
    %167 = math.tanh %161 : vector<8x128xf32>
    %168 = vector.extract_strided_slice %166 {offsets = [0, 0], sizes = [8, 32], strides = [1, 1]} : vector<8x128xf32> to vector<8x32xf32>
    %169 = vector.extract_strided_slice %167 {offsets = [0, 64], sizes = [8, 32], strides = [1, 1]} : vector<8x128xf32> to vector<8x32xf32>
    %170 = vector.extract_strided_slice %166 {offsets = [0, 96], sizes = [8, 32], strides = [1, 1]} : vector<8x128xf32> to vector<8x32xf32>
    %171 = arith.mulf %168, %169 : vector<8x32xf32>
    %172 = math.tanh %171 : vector<8x32xf32>
    %173 = arith.mulf %170, %172 : vector<8x32xf32>
    %174 = tpu.concatenate %160, %173 in 1 : vector<8x32xf32>, vector<8x32xf32> -> vector<8x64xf32>
    %175 = arith.truncf %174 : vector<8x64xf32> to vector<8x64xbf16>
    %c0_26 = arith.constant 0 : index
    %c0_27 = arith.constant 0 : index
    %176 = vector.load %arg5[%c0_26, %c0_27] : memref<64x32xbf16, #tpu.memory_space<vmem>>, vector<64x32xbf16>
    %cst_28 = arith.constant dense<0.000000e+00> : vector<8x32xf32>
    %177 = tpu.matmul %175, %176, %cst_28 {dimension_numbers = #tpu.dot_dimension_numbers<[1], [0], [0], [1], [0, 0, 1, 1], [], []>} : vector<8x64xbf16>, vector<64x32xbf16>, vector<8x32xf32> -> vector<8x32xf32>
    %c0_29 = arith.constant 0 : index
    %c0_30 = arith.constant 0 : index
    %178 = vector.load %arg6[%c0_29, %c0_30] : memref<1x32xf32, #tpu.memory_space<vmem>>, vector<1x32xf32>
    %179 = vector.broadcast %178 : vector<1x32xf32> to vector<8x32xf32>
    %180 = arith.addf %177, %179 : vector<8x32xf32>
    %cst_31 = arith.constant 0.000000e+00 : f32
    %181 = vector.broadcast %cst_31 : f32 to vector<8x32xf32>
    %182 = arith.maximumf %180, %181 : vector<8x32xf32>
    %c0_32 = arith.constant 0 : index
    %c0_33 = arith.constant 0 : index
    %183 = vector.load %arg7[%c0_32, %c0_33] : memref<1x32xf32, #tpu.memory_space<vmem>>, vector<1x32xf32>
    %184 = vector.broadcast %183 : vector<1x32xf32> to vector<8x32xf32>
    %185 = arith.mulf %182, %184 : vector<8x32xf32>
    %cst_34 = arith.constant dense<0.000000e+00> : vector<8xf32>
    %186 = vector.multi_reduction <add>, %185, %cst_34 [1] : vector<8x32xf32> to vector<8xf32>
    %187 = vector.shape_cast %186 : vector<8xf32> to vector<8x1xf32>
    %c0_35 = arith.constant 0 : index
    %c0_36 = arith.constant 0 : index
    %188 = vector.load %arg8[%c0_35, %c0_36] : memref<1x1xf32, #tpu.memory_space<vmem>>, vector<1x1xf32>
    %189 = vector.broadcast %188 : vector<1x1xf32> to vector<8x1xf32>
    %190 = arith.addf %187, %189 : vector<8x1xf32>
    %191 = arith.negf %190 : vector<8x1xf32>
    %192 = math.exp %191 : vector<8x1xf32>
    %cst_37 = arith.constant 1.000000e+00 : f32
    %193 = vector.broadcast %cst_37 : f32 to vector<8x1xf32>
    %194 = arith.addf %193, %192 : vector<8x1xf32>
    %195 = arith.divf %193, %194 : vector<8x1xf32>
    %c0_38 = arith.constant 0 : index
    %c0_39 = arith.constant 0 : index
    %196 = vector.load %arg9[%c0_38, %c0_39] : memref<8x1xf32, #tpu.memory_space<vmem>>, vector<8x1xf32>
    tpu.vector_store %arg9[%c0_38, %c0_39], %195 {strides = array<i32>} : memref<8x1xf32, #tpu.memory_space<vmem>>, vector<8x1xf32>,
    return
  }
  func.func @transform_0(%arg0: i32) -> (i32, i32) {
    %c0_i32 = arith.constant 0 : i32
    %c0_i32_0 = arith.constant 0 : i32
    %c0_i32_1 = arith.constant 0 : i32
    return %c0_i32, %c0_i32_0 : i32, i32
  }
  func.func @transform_1(%arg0: i32) -> (i32, i32) {
    %c0_i32 = arith.constant 0 : i32
    %c0_i32_0 = arith.constant 0 : i32
    %c0_i32_1 = arith.constant 0 : i32
    return %c0_i32, %c0_i32_0 : i32, i32
  }
  func.func @transform_2(%arg0: i32) -> (i32, i32) {
    %c0_i32 = arith.constant 0 : i32
    %c0_i32_0 = arith.constant 0 : i32
    %c0_i32_1 = arith.constant 0 : i32
    return %c0_i32, %c0_i32_0 : i32, i32
  }
  func.func @transform_3(%arg0: i32) -> (i32, i32) {
    %c0_i32 = arith.constant 0 : i32
    %c0_i32_0 = arith.constant 0 : i32
    %c0_i32_1 = arith.constant 0 : i32
    return %c0_i32, %c0_i32_0 : i32, i32
  }
  func.func @transform_4(%arg0: i32) -> (i32, i32) {
    %c0_i32 = arith.constant 0 : i32
    %c0_i32_0 = arith.constant 0 : i32
    %c0_i32_1 = arith.constant 0 : i32
    return %c0_i32, %c0_i32_0 : i32, i32
  }
  func.func @transform_5(%arg0: i32) -> (i32, i32) {
    %c0_i32 = arith.constant 0 : i32
    %c0_i32_0 = arith.constant 0 : i32
    %c0_i32_1 = arith.constant 0 : i32
    return %c0_i32, %c0_i32_0 : i32, i32
  }
  func.func @transform_6(%arg0: i32) -> (i32, i32) {
    %c0_i32 = arith.constant 0 : i32
    %c0_i32_0 = arith.constant 0 : i32
    %c0_i32_1 = arith.constant 0 : i32
    return %c0_i32, %c0_i32_0 : i32, i32
  }
  func.func @transform_7(%arg0: i32) -> (i32, i32) {
    %c0_i32 = arith.constant 0 : i32
    %c0_i32_0 = arith.constant 0 : i32
    %c0_i32_1 = arith.constant 0 : i32
    return %c0_i32, %c0_i32_0 : i32, i32
  }
  func.func @transform_8(%arg0: i32) -> (i32, i32) {
    %c0_i32 = arith.constant 0 : i32
    %c0_i32_0 = arith.constant 0 : i32
    %c0_i32_1 = arith.constant 0 : i32
    return %c0_i32, %c0_i32_0 : i32, i32
  }
}

</mosaic_0001>

<bundles_post_ra>
// kernel: tpu_custom_call.1
= control target key start
LH: loop header
LB: loop body
LE: loop exit
PB: predicated region body
PF: predicated region fallthrough
CT: control target
= control target key end

     0   :  { %v1152_v1 = vmov 0   ;;  %vm96_vm0 = vcmask 261120   ;;  %v1153_v8 = vmov 0.0   ;;  %vm1154_vm1 = vmmov 0   ;;  %s1156_s21 = smov 32   ;;  %s1397_s1 = inlined_call_operand.vmem [shape: bf16[32,256], index: 1, kind: input, shape index: {}]   ;;  %s1398_s0 = inlined_call_operand.vmem [shape: bf16[64,32], index: 0, kind: input, shape index: {}]   ;;  %s1399_s3 = inlined_call_operand.vmem [shape: bf16[32,128], index: 3, kind: input, shape index: {}]   ;;  %s1400_s2 = inlined_call_operand.vmem [shape: f32[1,256], index: 2, kind: input, shape index: {}]   ;;  %s1401_s4 = inlined_call_operand.vmem [shape: bf16[64,32], index: 4, kind: input, shape index: {}]   ;;  %s1402_s7 = inlined_call_operand.<no memory space> [shape: f32[1,1], index: 7, kind: input, shape index: {}]   ;;  %s1403_s5 = inlined_call_operand.vmem [shape: f32[1,32], index: 5, kind: input, shape index: {}]   ;;  %s1404_s6 = inlined_call_operand.vmem [shape: f32[1,32], index: 6, kind: input, shape index: {}]   ;;  %s1405_s8 = inlined_call_operand.vmem [shape: f32[8,1], index: 8, kind: output, shape index: {}]  }
   0x1   :  { %v1060_v0 = vld [vmem:[%s1397_s1 + $0x14] ss:$8 sps:$4 sm:$0xff]   ;;  %165 = vmatprep.mubr.bf16.mxu1 %v1152_v1  ;;  %141 = vmatprep.mubr.bf16.mxu0 %v1152_v1  ;;  %v1062_v2 = vld [vmem:[%s1397_s1 + $0x10] ss:$8 sps:$4 sm:$0xff]   ;;  %v1063_v3 = vld [vmem:[%s1397_s1 + $0x4] ss:$8 sps:$4 sm:$0xff]   ;;  %v46_v10 = vlaneseq }
   0x2   :  { %1050 = vmatprep.subr.bf16.mxu1 %v1060_v0  ;;  %121 = vmatprep.subr.bf16.mxu0 %v1060_v0  ;;  %v1065_v4 = vld [vmem:[%s1397_s1] ss:$8 sps:$4 sm:$0xff]   ;;  %v1066_v5 = vld [vmem:[%s1398_s0 + $0x18] sm:$0xff]   ;;  %vm830_vm2 = vcmask 523264   ;;  %vm900_vm3 = vcmask 7168  }
   0x3   :  { %1052 = vmatpush1.bf16.msra.mxu1 %v1062_v2  ;;  %122 = vmatpush1.bf16.msra.mxu0 %v1062_v2  ;;  %v1067_v6 = vld [vmem:[%s1398_s0] sm:$0xff]   ;;  %v1226_v7 = vld [vmem:[%s1399_s3 + $0x8] sm:$0xff]   ;;  %v1255_v11 = vshrl.u32 %v46_v10, 7 }
   0x4   :  { %1051 = vmatprep.subr.bf16.mxu1 %v1063_v3  ;;  %123 = vmatprep.subr.bf16.mxu0 %v1063_v3  ;;  %v1236_v9 = vld [vmem:[%s1399_s3] sm:$0xff]   ;;  %v1070_v60 = vld [vmem:[%s1398_s0 + $0x8] sm:$0xff]  }
   0x5   :  { %v48_v12 = vsub.s32 0, %v1255_v11  ;;  %v1261_v13 = vld [vmem:[%s1400_s2] sm:$0x3]  ;;  %s1155_s2 = smov 64  }
   0x7   :  { %1053 = vmatpush1.bf16.msra.mxu1 %v1065_v4  ;;  %124 = vmatpush1.bf16.msra.mxu0 %v1065_v4  ;;  %v1266_v18 = vrot.slane %v1261_v13, %v48_v12 }
   0x8   :  { %974 = vmatprep.subr.bf16.mxu1 %v1153_v8  ;;  %1006 = vmatprep.subr.bf16.mxu0 %v1153_v8 }
   0xa   :  { %917 = vmatmul.mubr.msk.bf16.vlgmr.msra.gmra.mxu1 %vm96_vm0, %v1066_v5  ;;  %914 = vmatmul.mubr.msk.bf16.vlgmr.msra.gmra.mxu0 %vm96_vm0, %v1067_v6 }
   0xb   :  { %975 = vmatpush3.bf16.msra.mxu1 %v1226_v7  ;;  %978 = vmatprep.mubr.msk.bf16.mxu1 %vm1154_vm1, %v1153_v8 }
   0xc   :  { %976 = vmatprep.subr.bf16.mxu1 %v1153_v8  ;;  %149 = vmatprep.mubr.bf16.mxu0 %v1152_v1 }
   0xd   :  { %1007 = vmatpush3.bf16.msra.mxu0 %v1226_v7 }
   0xe   :  { %1008 = vmatprep.subr.bf16.mxu0 %v1153_v8 }
   0xf   :  { %977 = vmatpush3.bf16.msra.mxu1 %v1236_v9 }
  0x10   :  { %982 = vmatprep.subr.bf16.mxu1 %v1153_v8 }
  0x11   :  { %1009 = vmatpush3.bf16.msra.mxu0 %v1236_v9 }
  0x12   :  { %979 = vmatmul.mubr.bf16.vlgmr.msra.gmra.mxu1 %v1152_v1  ;;  %1022 = vmatprep.subr.bf16.mxu0 %v1153_v8 }
  0x13   :  { %983 = vmatpush3.bf16.msra.mxu1 %v1226_v7  ;;  %986 = vmatprep.mubr.msk.bf16.mxu1 %vm1154_vm1, %v1153_v8 }
  0x14   :  { %984 = vmatprep.subr.bf16.mxu1 %v1153_v8  ;;  %915 = vmatmul.mubr.msk.bf16.gmra.mxu0 %vm96_vm0, %v1070_v60 }
  0x15   :  { %157 = vmatprep.mubr.bf16.mxu0 %v1152_v1 }
  0x17   :  { %985 = vmatpush3.bf16.msra.mxu1 %v1236_v9 }
  0x18   :  { %990 = vmatprep.subr.bf16.mxu1 %v1153_v8 }
  0xca   :  { %v1263_v14 = vpop.f32.mrf.mxu1  ;;  %v143_v15 = vpop.f32.mrf.mxu0 }
  0xcb   :  { %v144_v21 = vadd.f32 %v143_v15, %v1266_v18 }
  0xcc   :  { %v169_v16 = vpop.f32.mrf.mxu1  ;;  %v145_v17 = vpop.f32.mrf.mxu0 }
  0xce   :  { %v1268_v19 = vpop.f32.mrf.mxu1  ;;  %v146_v20 = vpop.f32.mrf.mxu0 }
  0xcf   :  { %v147_v44 = vadd.f32 %v146_v20, %v1266_v18 }
  0xd0   :  { %v1271_v22 = vpop.f32.mrf.mxu1  ;;  %v148_v23 = vpop.f32.mrf.mxu0 }
  0xd2   :  { %v228_v24 = vpop.f32.mrf.mxu1 }
  0xd3   :  { %v234_v25 = vadd.f32 %v228_v24, %v144_v21 }
  0xd4   :  { %v980_v26 = vpop.f32.mrf.mxu1  ;;  %v151_v2 = vpop.f32.mrf.mxu0 }
  0xd5   :  { %1076 = vtanh.f32 %v234_v25  ;;  %v920_v30 = vmul.f32 -1.442695, %v234_v25  ;;  %v152_v1 = vadd.f32 %v151_v2, %v1266_v18 }
  0xd6   :  { %v231_v27 = vpop.f32.mrf.mxu1  ;;  %v153_v3 = vpop.f32.mrf.mxu0 }
  0xd7   :  { %1078 = vpow2.f32 %v920_v30 }
  0xd8   :  { %v981_v28 = vpop.f32.mrf.mxu1  ;;  %v154_v4 = vpop.f32.mrf.mxu0 }
  0xda   :  { %v156_v5 = vpop.f32.mrf.mxu0 }
  0xe2   :  { %v1077_v29 = vpop.eup %1076 }
  0xe3   :  { %244 = vrot.lane.b32.xlu0 %v1077_v29, %s1155_s2 }
  0xe4   :  { %v1079_v31 = vpop.eup %1078 }
  0xe5   :  { %v238_v32 = vadd.f32 1.0, %v1079_v31 }
  0xe7   :  { %1080 = vrcp.f32 %v238_v32 }
  0xf4   :  { %v1081_v33 = vpop.eup %1080 }
  0xf5   :  { %v242_v36 = vmul.f32 0.0, %v1081_v33 }
 0x155   :  { %v245_v34 = vpop.permute.xlu0 %244 }
 0x156   :  { %v247_v35 = vmul.f32 %v1081_v33, %v245_v34 }
 0x158   :  { %249 = vrot.lane.b32.xlu0 %v247_v35, %s1156_s21 }
 0x1ca   :  { %v250_v37 = vpop.permute.xlu0 %249 }
 0x1cb   :  { %v252_v38 = vadd.f32 %v250_v37, %v242_v36  ;;  %v155_v36 = vadd.f32 %v154_v4, %v1266_v18 }
 0x1cd   :  { %1082 = vtanh.f32 %v252_v38 }
 0x1da   :  { %v1083_v39 = vpop.eup %1082 }
 0x1db   :  { %255 = vrot.lane.b32.xlu1 %v1083_v39, %s1155_s2 }
 0x24d   :  { %v256_v40 = vpop.permute.xlu1 %255 }
 0x24e   :  { %v258_v41 = vmul.f32 %v1081_v33, %v256_v40 }
 0x250   :  { %v259_v42 = vpack.c.bf16 %v258_v41, %v258_v41 }
 0x252   :  { %261 = vrot.lane.b32.xlu1 %v259_v42, %s1156_s21 }
 0x2c4   :  { %v262_v43 = vpop.permute.xlu1 %261 }
 0x2c5   :  { %987 = vmatmul.mubr.msk.bf16.vlgmr.msra.gmra.mxu1 %vm96_vm0, %v262_v43 }
 0x2c6   :  { %991 = vmatpush3.bf16.msra.mxu1 %v1226_v7  ;;  %994 = vmatprep.mubr.msk.bf16.mxu1 %vm1154_vm1, %v1153_v8 }
 0x2c7   :  { %992 = vmatprep.subr.bf16.mxu1 %v1153_v8 }
 0x2ca   :  { %993 = vmatpush3.bf16.msra.mxu1 %v1236_v9 }
 0x2cb   :  { %998 = vmatprep.subr.bf16.mxu1 %v1153_v8 }
 0x385   :  { %v300_v45 = vpop.f32.mrf.mxu1 }
 0x386   :  { %v306_v46 = vadd.f32 %v300_v45, %v147_v44 }
 0x387   :  { %v988_v47 = vpop.f32.mrf.mxu1 }
 0x388   :  { %1084 = vtanh.f32 %v306_v46  ;;  %v922_v51 = vmul.f32 -1.442695, %v306_v46 }
 0x389   :  { %v303_v48 = vpop.f32.mrf.mxu1 }
 0x38a   :  { %1086 = vpow2.f32 %v922_v51 }
 0x38b   :  { %v989_v49 = vpop.f32.mrf.mxu1 }
 0x395   :  { %v1085_v50 = vpop.eup %1084 }
 0x396   :  { %316 = vrot.lane.b32.xlu0 %v1085_v50, %s1155_s2 }
 0x397   :  { %v1087_v52 = vpop.eup %1086 }
 0x398   :  { %v310_v53 = vadd.f32 1.0, %v1087_v52  ;;  %v1071_v52 = vld [vmem:[%s1398_s0 + $0x10] sm:$0xff]   ;;  %s1157_s0 = smov 96  }
 0x399   :  { %916 = vmatmul.mubr.msk.bf16.gmra.mxu0 %vm96_vm0, %v1071_v52 }
 0x39a   :  { %1088 = vrcp.f32 %v310_v53  ;;  %1010 = vmatprep.mubr.msk.bf16.mxu0 %vm1154_vm1, %v1153_v8 }
 0x3a7   :  { %v1089_v54 = vpop.eup %1088 }
 0x3a8   :  { %v314_v57 = vmul.f32 %v1089_v54, %v252_v38 }
 0x408   :  { %v317_v55 = vpop.permute.xlu0 %316 }
 0x409   :  { %v319_v56 = vmul.f32 %v1089_v54, %v317_v55 }
 0x40b   :  { %321 = vrot.lane.b32.xlu1 %v319_v56, %s1156_s21 }
 0x47d   :  { %v322_v58 = vpop.permute.xlu1 %321 }
 0x47e   :  { %v324_v59 = vadd.f32 %v322_v58, %v314_v57  ;;  %v159_v57 = vpop.f32.mrf.mxu0 }
 0x480   :  { %1090 = vtanh.f32 %v324_v59  ;;  %v161_v58 = vpop.f32.mrf.mxu0 }
 0x48d   :  { %v1091_v61 = vpop.eup %1090 }
 0x48e   :  { %327 = vrot.lane.b32.xlu0 %v1091_v61, %s1155_s2 }
 0x500   :  { %v328_v62 = vpop.permute.xlu0 %327 }
 0x501   :  { %v330_v63 = vmul.f32 %v1089_v54, %v328_v62  ;;  %v160_v62 = vadd.f32 %v159_v57, %v1266_v18 }
 0x503   :  { %v331_v0 = vpack.c.bf16 %v330_v63, %v330_v63 }
 0x505   :  { %333 = vrot.lane.b32.xlu1 %v331_v0, %s1156_s21 }
 0x577   :  { %v334_v6 = vpop.permute.xlu1 %333 }
 0x578   :  { %995 = vmatmul.mubr.msk.bf16.vlgmr.msra.gmra.mxu1 %vm96_vm0, %v334_v6 }
 0x579   :  { %999 = vmatpush3.bf16.msra.mxu1 %v1226_v7  ;;  %1002 = vmatprep.mubr.msk.bf16.mxu1 %vm1154_vm1, %v1153_v8 }
 0x57a   :  { %1000 = vmatprep.subr.bf16.mxu1 %v1153_v8 }
 0x57d   :  { %1001 = vmatpush3.bf16.msra.mxu1 %v1236_v9 }
 0x57e   :  { %1014 = vmatprep.subr.bf16.mxu1 %v1153_v8 }
 0x638   :  { %v372_v10 = vpop.f32.mrf.mxu1 }
 0x639   :  { %v378_v12 = vadd.f32 %v372_v10, %v152_v1 }
 0x63a   :  { %v996_v15 = vpop.f32.mrf.mxu1 }
 0x63b   :  { %1092 = vtanh.f32 %v378_v12  ;;  %v924_v21 = vmul.f32 -1.442695, %v378_v12 }
 0x63c   :  { %v375_v16 = vpop.f32.mrf.mxu1 }
 0x63d   :  { %1094 = vpow2.f32 %v924_v21 }
 0x63e   :  { %v997_v17 = vpop.f32.mrf.mxu1 }
 0x648   :  { %v1093_v20 = vpop.eup %1092 }
 0x649   :  { %388 = vrot.lane.b32.xlu0 %v1093_v20, %s1155_s2 }
 0x64a   :  { %v1095_v23 = vpop.eup %1094 }
 0x64b   :  { %v382_v24 = vadd.f32 1.0, %v1095_v23 }
 0x64d   :  { %1096 = vrcp.f32 %v382_v24 }
 0x65a   :  { %v1097_v25 = vpop.eup %1096 }
 0x65b   :  { %v386_v28 = vmul.f32 %v1097_v25, %v324_v59  ;;  %v162_v59 = vpop.f32.mrf.mxu0 }
 0x65d   :  { %v164_v60 = vpop.f32.mrf.mxu0 }
 0x6bb   :  { %v389_v26 = vpop.permute.xlu0 %388 }
 0x6bc   :  { %v391_v27 = vmul.f32 %v1097_v25, %v389_v26 }
 0x6be   :  { %393 = vrot.lane.b32.xlu1 %v391_v27, %s1156_s21 }
 0x730   :  { %v394_v29 = vpop.permute.xlu1 %393 }
 0x731   :  { %v396_v30 = vadd.f32 %v394_v29, %v386_v28  ;;  %v163_v28 = vadd.f32 %v162_v59, %v1266_v18 }
 0x733   :  { %1098 = vtanh.f32 %v396_v30 }
 0x740   :  { %v1099_v31 = vpop.eup %1098 }
 0x741   :  { %399 = vrot.lane.b32.xlu0 %v1099_v31, %s1155_s2 }
 0x7b3   :  { %v400_v32 = vpop.permute.xlu0 %399 }
 0x7b4   :  { %v402_v33 = vmul.f32 %v1097_v25, %v400_v32 }
 0x7b6   :  { %v403_v34 = vpack.c.bf16 %v402_v33, %v402_v33 }
 0x7b8   :  { %405 = vrot.lane.b32.xlu1 %v403_v34, %s1156_s21 }
 0x82a   :  { %v406_v35 = vpop.permute.xlu1 %405 }
 0x82b   :  { %1003 = vmatmul.mubr.msk.bf16.vlgmr.msra.gmra.mxu1 %vm96_vm0, %v406_v35 }
 0x82c   :  { %1015 = vmatpush3.bf16.msra.mxu1 %v1226_v7  ;;  %1018 = vmatprep.mubr.msk.bf16.mxu1 %vm1154_vm1, %v1153_v8 }
 0x82d   :  { %1016 = vmatprep.subr.bf16.mxu1 %v1153_v8 }
 0x830   :  { %1017 = vmatpush3.bf16.msra.mxu1 %v1236_v9 }
 0x831   :  { %1030 = vmatprep.subr.bf16.mxu1 %v1153_v8 }
 0x8eb   :  { %v444_v37 = vpop.f32.mrf.mxu1 }
 0x8ec   :  { %v450_v38 = vadd.f32 %v444_v37, %v155_v36 }
 0x8ed   :  { %v1004_v39 = vpop.f32.mrf.mxu1 }
 0x8ee   :  { %1100 = vtanh.f32 %v450_v38  ;;  %v926_v43 = vmul.f32 -1.442695, %v450_v38 }
 0x8ef   :  { %v447_v40 = vpop.f32.mrf.mxu1 }
 0x8f0   :  { %1102 = vpow2.f32 %v926_v43 }
 0x8f1   :  { %v1005_v41 = vpop.f32.mrf.mxu1 }
 0x8fb   :  { %v1101_v42 = vpop.eup %1100 }
 0x8fc   :  { %460 = vrot.lane.b32.xlu0 %v1101_v42, %s1155_s2 }
 0x8fd   :  { %v1103_v44 = vpop.eup %1102 }
 0x8fe   :  { %v454_v45 = vadd.f32 1.0, %v1103_v44 }
 0x900   :  { %1104 = vrcp.f32 %v454_v45 }
 0x90d   :  { %v1105_v46 = vpop.eup %1104 }
 0x90e   :  { %v458_v49 = vmul.f32 %v1105_v46, %v396_v30 }
 0x96e   :  { %v461_v47 = vpop.permute.xlu0 %460 }
 0x96f   :  { %v463_v48 = vmul.f32 %v1105_v46, %v461_v47  ;;  %v168_v47 = vadd.f32 %v1263_v14, %v1266_v18 }
 0x971   :  { %465 = vrot.lane.b32.xlu1 %v463_v48, %s1156_s21 }
 0x9e3   :  { %v466_v50 = vpop.permute.xlu1 %465 }
 0x9e4   :  { %v468_v51 = vadd.f32 %v466_v50, %v458_v49 }
 0x9e6   :  { %1106 = vtanh.f32 %v468_v51 }
 0x9f3   :  { %v1107_v53 = vpop.eup %1106 }
 0x9f4   :  { %471 = vrot.lane.b32.xlu0 %v1107_v53, %s1155_s2 }
 0xa66   :  { %v472_v54 = vpop.permute.xlu0 %471 }
 0xa67   :  { %v474_v55 = vmul.f32 %v1105_v46, %v472_v54 }
 0xa69   :  { %v475_v56 = vpack.c.bf16 %v474_v55, %v474_v55 }
 0xa6b   :  { %477 = vrot.lane.b32.xlu1 %v475_v56, %s1156_s21 }
 0xadd   :  { %v478_v61 = vpop.permute.xlu1 %477 }
 0xade   :  { %1011 = vmatmul.mubr.msk.bf16.vlgmr.msra.gmra.mxu0 %vm96_vm0, %v478_v61 }
 0xadf   :  { %1023 = vmatpush3.bf16.msra.mxu0 %v1226_v7  ;;  %1026 = vmatprep.mubr.msk.bf16.mxu0 %vm1154_vm1, %v1153_v8 }
 0xae0   :  { %1024 = vmatprep.subr.bf16.mxu0 %v1153_v8 }
 0xae3   :  { %1025 = vmatpush3.bf16.msra.mxu0 %v1236_v9 }
 0xae4   :  { %1038 = vmatprep.subr.bf16.mxu0 %v1153_v8 }
 0xb9e   :  { %v516_v63 = vpop.f32.mrf.mxu0 }
 0xb9f   :  { %v522_v0 = vadd.f32 %v516_v63, %v160_v62 }
 0xba0   :  { %v1012_v2 = vpop.f32.mrf.mxu0 }
 0xba1   :  { %1108 = vtanh.f32 %v522_v0  ;;  %v928_v6 = vmul.f32 -1.442695, %v522_v0 }
 0xba2   :  { %v519_v3 = vpop.f32.mrf.mxu0 }
 0xba3   :  { %1110 = vpow2.f32 %v928_v6 }
 0xba4   :  { %v1013_v4 = vpop.f32.mrf.mxu0 }
 0xba5   :  { %v52_v4 = vsub.s32 1, %v1255_v11 }
 0xba7   :  { %v53_v6 = vrot.slane %v1261_v13, %v52_v4 }
 0xbae   :  { %v1109_v5 = vpop.eup %1108 }
 0xbaf   :  { %532 = vrot.lane.b32.xlu0 %v1109_v5, %s1155_s2  ;;  %v171_v5 = vadd.f32 %v1268_v19, %v1266_v18 }
 0xbb0   :  { %v1111_v1 = vpop.eup %1110 }
 0xbb1   :  { %v526_v10 = vadd.f32 1.0, %v1111_v1 }
 0xbb3   :  { %1112 = vrcp.f32 %v526_v10 }
 0xbc0   :  { %v1113_v12 = vpop.eup %1112 }
 0xbc1   :  { %v530_v17 = vmul.f32 %v1113_v12, %v468_v51 }
 0xc21   :  { %v533_v15 = vpop.permute.xlu0 %532 }
 0xc22   :  { %v535_v16 = vmul.f32 %v1113_v12, %v533_v15  ;;  %v173_v15 = vadd.f32 %v1271_v22, %v53_v6 }
 0xc24   :  { %537 = vrot.lane.b32.xlu1 %v535_v16, %s1156_s21 }
 0xc96   :  { %v538_v20 = vpop.permute.xlu1 %537 }
 0xc97   :  { %v540_v21 = vadd.f32 %v538_v20, %v530_v17 }
 0xc99   :  { %1114 = vtanh.f32 %v540_v21 }
 0xca6   :  { %v1115_v23 = vpop.eup %1114 }
 0xca7   :  { %543 = vrot.lane.b32.xlu0 %v1115_v23, %s1155_s2  ;;  %v935_v23 = vmul.f32 -1.442695, %v173_v15 }
 0xd19   :  { %v544_v24 = vpop.permute.xlu0 %543 }
 0xd1a   :  { %v546_v25 = vmul.f32 %v1113_v12, %v544_v24 }
 0xd1c   :  { %v547_v26 = vpack.c.bf16 %v546_v25, %v546_v25 }
 0xd1e   :  { %549 = vrot.lane.b32.xlu1 %v547_v26, %s1156_s21 }
 0xd90   :  { %v550_v27 = vpop.permute.xlu1 %549 }
 0xd91   :  { %1019 = vmatmul.mubr.msk.bf16.vlgmr.msra.gmra.mxu1 %vm96_vm0, %v550_v27 }
 0xd92   :  { %1031 = vmatpush3.bf16.msra.mxu1 %v1226_v7  ;;  %1034 = vmatprep.mubr.msk.bf16.mxu1 %vm1154_vm1, %v1153_v8 }
 0xd93   :  { %1032 = vmatprep.subr.bf16.mxu1 %v1153_v8 }
 0xd96   :  { %1033 = vmatpush3.bf16.msra.mxu1 %v1236_v9 }
 0xe51   :  { %v588_v29 = vpop.f32.mrf.mxu1 }
 0xe52   :  { %v594_v30 = vadd.f32 %v588_v29, %v163_v28 }
 0xe53   :  { %v1020_v31 = vpop.f32.mrf.mxu1 }
 0xe54   :  { %1116 = vtanh.f32 %v594_v30  ;;  %v930_v35 = vmul.f32 -1.442695, %v594_v30 }
 0xe55   :  { %v591_v32 = vpop.f32.mrf.mxu1 }
 0xe56   :  { %1118 = vpow2.f32 %v930_v35  ;;  %v1073_v35 = vld [vmem:[%s1401_s4 + $0x10] sm:$0xff]  }
 0xe57   :  { %v1021_v33 = vpop.f32.mrf.mxu1 }
 0xe61   :  { %v1117_v34 = vpop.eup %1116 }
 0xe62   :  { %604 = vrot.lane.b32.xlu0 %v1117_v34, %s1155_s2  ;;  %v1072_v34 = vld [vmem:[%s1401_s4 + $0x18] sm:$0xff]  }
 0xe63   :  { %v1119_v7 = vpop.eup %1118 }
 0xe64   :  { %v598_v36 = vadd.f32 1.0, %v1119_v7  ;;  %v1074_v7 = vld [vmem:[%s1401_s4 + $0x8] sm:$0xff]  }
 0xe66   :  { %1120 = vrcp.f32 %v598_v36 }
 0xe73   :  { %v1121_v37 = vpop.eup %1120 }
 0xe74   :  { %v602_v9 = vmul.f32 %v1121_v37, %v540_v21 }
 0xed4   :  { %v605_v38 = vpop.permute.xlu0 %604 }
 0xed5   :  { %v607_v39 = vmul.f32 %v1121_v37, %v605_v38 }
 0xed7   :  { %609 = vrot.lane.b32.xlu1 %v607_v39, %s1156_s21  ;;  %v1075_v39 = vld [vmem:[%s1401_s4] sm:$0xff]  }
 0xf49   :  { %v610_v40 = vpop.permute.xlu1 %609 }
 0xf4a   :  { %v612_v41 = vadd.f32 %v610_v40, %v602_v9 }
 0xf4c   :  { %1122 = vtanh.f32 %v612_v41 }
 0xf59   :  { %v1123_v42 = vpop.eup %1122 }
 0xf5a   :  { %615 = vrot.lane.b32.xlu0 %v1123_v42, %s1155_s2 }
 0xfcc   :  { %v616_v43 = vpop.permute.xlu0 %615 }
 0xfcd   :  { %v618_v44 = vmul.f32 %v1121_v37, %v616_v43 }
 0xfcf   :  { %v619_v45 = vpack.c.bf16 %v618_v44, %v618_v44 }
 0xfd1   :  { %621 = vrot.lane.b32.xlu1 %v619_v45, %s1156_s21  ;;  %v936_v45 = vld [vmem:[%s1403_s5] ss:$0 sm:$0xff] }
0x1043   :  { %v622_v46 = vpop.permute.xlu1 %621 }
0x1044   :  { %1027 = vmatmul.mubr.msk.bf16.vlgmr.msra.gmra.mxu0 %vm96_vm0, %v622_v46 }
0x1045   :  { %1046 = vmatprep.mubr.msk.bf16.mxu0 %vm1154_vm1, %v1153_v8  ;;  %1039 = vmatpush3.bf16.msra.mxu0 %v1072_v34 }
0x1046   :  { %1040 = vmatprep.subr.bf16.mxu0 %v1153_v8 }
0x1049   :  { %1041 = vmatpush3.bf16.msra.mxu0 %v1073_v35 }
0x104a   :  { %1042 = vmatprep.subr.bf16.mxu0 %v1153_v8 }
0x104d   :  { %1043 = vmatpush3.bf16.msra.mxu0 %v1074_v7 }
0x104e   :  { %1044 = vmatprep.subr.bf16.mxu0 %v1153_v8  ;;  %v13_v8 = vstv %s1402_s7 }
0x104f   :  { %14 = vst [vmem:[#allocation2] sm:$0x1] %v13_v8 }
0x1051   :  { %1045 = vmatpush3.bf16.msra.mxu0 %v1075_v39 }
0x1104   :  { %v660_v48 = vpop.f32.mrf.mxu0 }
0x1105   :  { %v666_v49 = vadd.f32 %v660_v48, %v168_v47 }
0x1106   :  { %v1028_v50 = vpop.f32.mrf.mxu0 }
0x1107   :  { %1124 = vtanh.f32 %v666_v49  ;;  %v932_v54 = vmul.f32 -1.442695, %v666_v49  ;;  %v942_v49 = vld [vmem:[%s1404_s6] ss:$0 sm:$0xff] }
0x1108   :  { %v663_v51 = vpop.f32.mrf.mxu0 }
0x1109   :  { %1126 = vpow2.f32 %v932_v54 }
0x110a   :  { %v1029_v52 = vpop.f32.mrf.mxu0 }
0x1114   :  { %v1125_v53 = vpop.eup %1124 }
0x1115   :  { %676 = vrot.lane.b32.xlu0 %v1125_v53, %s1155_s2 }
0x1116   :  { %v1127_v55 = vpop.eup %1126 }
0x1117   :  { %v670_v56 = vadd.f32 1.0, %v1127_v55  ;;  %v943_v55 = vld [vmem:[#allocation2] ss:$0 sm:$0xff] }
0x1119   :  { %1128 = vrcp.f32 %v670_v56 }
0x1126   :  { %v1129_v57 = vpop.eup %1128 }
0x1127   :  { %v674_v14 = vmul.f32 %v1129_v57, %v612_v41 }
0x1187   :  { %v677_v58 = vpop.permute.xlu0 %676 }
0x1188   :  { %v679_v59 = vmul.f32 %v1129_v57, %v677_v58 }
0x118a   :  { %681 = vrot.lane.b32.xlu1 %v679_v59, %s1156_s21 }
0x11fc   :  { %v682_v60 = vpop.permute.xlu1 %681 }
0x11fd   :  { %v684_v61 = vadd.f32 %v682_v60, %v674_v14 }
0x11ff   :  { %1130 = vtanh.f32 %v684_v61 }
0x120c   :  { %v1131_v62 = vpop.eup %1130 }
0x120d   :  { %687 = vrot.lane.b32.xlu0 %v1131_v62, %s1155_s2 }
0x127f   :  { %v688_v63 = vpop.permute.xlu0 %687 }
0x1280   :  { %v690_v0 = vmul.f32 %v1129_v57, %v688_v63 }
0x1282   :  { %v691_v2 = vpack.c.bf16 %v690_v0, %v690_v0 }
0x1284   :  { %693 = vrot.lane.b32.xlu1 %v691_v2, %s1156_s21 }
0x12f6   :  { %v694_v3 = vpop.permute.xlu1 %693 }
0x12f7   :  { %1035 = vmatmul.mubr.msk.bf16.vlgmr.msra.gmra.mxu1 %vm96_vm0, %v694_v3 }
0x13b7   :  { %v732_v1 = vpop.f32.mrf.mxu1 }
0x13b8   :  { %v738_v10 = vadd.f32 %v732_v1, %v171_v5 }
0x13b9   :  { %v1036_v12 = vpop.f32.mrf.mxu1 }
0x13ba   :  { %1132 = vtanh.f32 %v738_v10  ;;  %v934_v11 = vmul.f32 -1.442695, %v738_v10 }
0x13bb   :  { %v735_v16 = vpop.f32.mrf.mxu1  ;;  %1134 = vtanh.f32 %v173_v15 }
0x13bc   :  { %1136 = vpow2.f32 %v934_v11 }
0x13bd   :  { %v1037_v17 = vpop.f32.mrf.mxu1  ;;  %1138 = vpow2.f32 %v935_v23 }
0x13c7   :  { %v1133_v20 = vpop.eup %1132 }
0x13c8   :  { %748 = vrot.lane.b32.xlu0 %v1133_v20, %s1155_s2  ;;  %v1135_v21 = vpop.eup %1134 }
0x13c9   :  { %v1137_v13 = vpop.eup %1136 }
0x13ca   :  { %v742_v18 = vadd.f32 1.0, %v1137_v13  ;;  %v1139_v19 = vpop.eup %1138 }
0x13cb   :  { %v766_v24 = vadd.f32 1.0, %v1139_v19 }
0x13cc   :  { %771 = vrot.lane.b32.xlu0 %v1135_v21, %s1155_s2  ;;  %1140 = vrcp.f32 %v742_v18 }
0x13cd   :  { %1142 = vrcp.f32 %v766_v24 }
0x13d9   :  { %v1141_v22 = vpop.eup %1140 }
0x13da   :  { %v1143_v27 = vpop.eup %1142  ;;  %v746_v31 = vmul.f32 %v1141_v22, %v684_v61 }
0x143a   :  { %v749_v25 = vpop.permute.xlu0 %748 }
0x143b   :  { %v751_v26 = vmul.f32 %v1141_v22, %v749_v25 }
0x143d   :  { %753 = vrot.lane.b32.xlu1 %v751_v26, %s1156_s21 }
0x143e   :  { %v772_v28 = vpop.permute.xlu0 %771 }
0x143f   :  { %v774_v29 = vmul.f32 %v1143_v27, %v772_v28 }
0x1441   :  { %1144 = vtanh.f32 %v774_v29 }
0x144e   :  { %v1145_v30 = vpop.eup %1144 }
0x144f   :  { %777 = vrot.lane.b32.xlu0 %v1145_v30, %s1157_s0 }
0x14af   :  { %v754_v32 = vpop.permute.xlu1 %753 }
0x14b0   :  { %v756_v33 = vadd.f32 %v754_v32, %v746_v31 }
0x14b2   :  { %1146 = vtanh.f32 %v756_v33 }
0x14bf   :  { %v1147_v36 = vpop.eup %1146 }
0x14c0   :  { %759 = vrot.lane.b32.xlu1 %v1147_v36, %s1155_s2 }
0x14c1   :  { %v778_v37 = vpop.permute.xlu0 %777 }
0x14c2   :  { %v780_v38 = vmul.f32 %v1143_v27, %v778_v37 }
0x14c4   :  { %786 = vrot.lane.b32.xlu0 %v780_v38, %s1155_s2 }
0x1532   :  { %v760_v9 = vpop.permute.xlu1 %759 }
0x1533   :  { %v762_v40 = vmul.f32 %v1141_v22, %v760_v9 }
0x1535   :  { %782 = vrot.lane.b32.xlu1 %v762_v40, %s1156_s21 }
0x1536   :  { %v787_v41 = vpop.permute.xlu0 %786 }
0x15a7   :  { %v783_v42 = vpop.permute.xlu1 %782 }
0x15a8   :  { %v789_v43 = vsel %vm96_vm0, %v783_v42, %v787_v41 }
0x15a9   :  { %v790_v44 = vpack.c.bf16 %v789_v43, %v789_v43 }
0x15ab   :  { %1047 = vmatmul.mubr.msk.bf16.vlgmr.msra.gmra.mxu0 %vm830_vm2, %v790_v44 }
0x166b   :  { %v868_v46 = vpop.f32.mrf.mxu0 }
0x166c   :  { %v869_v47 = vadd.f32 %v936_v45, %v868_v46 }
0x166d   :  { %v1048_v48 = vpop.f32.mrf.mxu0 }
0x166e   :  { %v874_v50 = vmax.f32 %v869_v47, 0.0 }
0x166f   :  { %v871_v51 = vpop.f32.mrf.mxu0 }
0x1670   :  { %v882_v52 = vmul.f32 %v942_v49, %v874_v50 }
0x1671   :  { %v1049_v53 = vpop.f32.mrf.mxu0 }
0x1672   :  { %v883_v54 = vsel %vm96_vm0, %v882_v52, 0.0 }
0x1673   :  { %884 = vadd.xlane.f32.xlu1 %v883_v54 }
0x16fc   :  { %v885_v56 = vpop.xlane.xlu1 %884 }
0x16fd   :  { %v893_v57 = vadd.f32 %v943_v55, %v885_v56 }
0x16ff   :  { %v944_v58 = vmul.f32 -1.442695, %v893_v57 }
0x1701   :  { %1148 = vpow2.f32 %v944_v58 }
0x170e   :  { %v1149_v59 = vpop.eup %1148 }
0x170f   :  { %v897_v14 = vadd.f32 1.0, %v1149_v59 }
0x1711   :  { %1150 = vrcp.f32 %v897_v14 }
0x171e   :  { %v1151_v60 = vpop.eup %1150 }
0x171f   :  { %901 = vst.msk [vmem:[%s1405_s8] sm:$0xff] %vm900_vm3, %v1151_v60 }

</bundles_post_ra>
